<compile_context>
chip_gen: v5e
topology: v5e:2x2
jax: 0.10.0
libtpu: 0.0.40
codegen_flags: <defaults>
</compile_context>

<pallas_src>
import functools

import jax
import jax.numpy as jnp
from jax.experimental import pallas as pl
from jax.experimental.pallas import tpu as pltpu

LANES = 128
SUBLANES = 8


def _gal_kernel(p_ref, c_ref, a_ref, b_ref, x_ref, o_ref, *, n_terms):
    # p_ref, c_ref: SMEM (2n+1,) ; a_ref, b_ref: SMEM (1,)
    # x_ref, o_ref: VMEM tiles of the flattened input / output.
    a = a_ref[0]
    b = b_ref[0]
    x = x_ref[...].astype(jnp.float32)
    # Fold the affine term into the accumulator init.
    acc = a * x + b
    # Tiny static reduction over the borders axis — unrolled at trace time.
    for j in range(n_terms):
        acc = acc + jnp.abs(x - p_ref[j]) * c_ref[j]
    o_ref[...] = acc.astype(o_ref.dtype)


def _pick_block_rows(rows, target):
    """Choose block rows: multiple of 8 sublanes, or the full rows dim."""
    target = max(SUBLANES, (target // SUBLANES) * SUBLANES)
    if rows > target:
        return target
    # Whole slab fits in one block; split in two when cleanly possible so the
    # "parallel" grid axis can use both TensorCores on megacore parts.
    half = rows // 2
    if half >= SUBLANES and half % SUBLANES == 0:
        return half
    return rows


def gal_forward(x, p, k, b_g, *, block_rows=2048):
    """x: array of any shape (e.g. NCHW). p: (2n+1,), k: (2n+2,), b_g: (1,)."""
    orig_shape = x.shape
    orig_dtype = x.dtype
    n_terms = p.shape[0]  # 2 * borders + 1

    # Derived parameters (tiny glue, stays in plain JAX — a few scalars only).
    a = ((k[0] + k[-1]) * 0.5).reshape(1).astype(jnp.float32)
    c = ((k[1:] - k[:-1]) * 0.5).astype(jnp.float32)
    p32 = p.astype(jnp.float32)
    b32 = jnp.reshape(b_g, (1,)).astype(jnp.float32)

    total = x.size
    if total % LANES == 0:
        # Common case: free contiguous reshape, no extra HBM pass.
        rows = total // LANES
        x2d = jnp.reshape(x, (rows, LANES))
        tail_pad = 0
    else:
        # Rare fallback: pad the tail up to a full 128-lane row.
        rows = -(-total // LANES)
        tail_pad = rows * LANES - total
        x2d = jnp.pad(jnp.ravel(x), (0, tail_pad)).reshape(rows, LANES)

    br = _pick_block_rows(rows, block_rows)
    grid = (pl.cdiv(rows, br),)

    out2d = pl.pallas_call(
        functools.partial(_gal_kernel, n_terms=n_terms),
        out_shape=jax.ShapeDtypeStruct((rows, LANES), orig_dtype),
        grid_spec=pltpu.PrefetchScalarGridSpec(
            num_scalar_prefetch=0,
            grid=grid,
            in_specs=[
                pl.BlockSpec(memory_space=pltpu.SMEM),  # p
                pl.BlockSpec(memory_space=pltpu.SMEM),  # c
                pl.BlockSpec(memory_space=pltpu.SMEM),  # a
                pl.BlockSpec(memory_space=pltpu.SMEM),  # b_g
                pl.BlockSpec((br, LANES), lambda i: (i, 0)),
            ],
            out_specs=pl.BlockSpec((br, LANES), lambda i: (i, 0)),
        ),
        compiler_params=pltpu.CompilerParams(
            dimension_semantics=("parallel",)),
    )(p32, c, a, b32, x2d)

    if tail_pad:
        out = jnp.reshape(out2d, (-1,))[:total].reshape(orig_shape)
    else:
        out = jnp.reshape(out2d, orig_shape)
    return out


def init_gal_params(key, borders=1,
                    k_initialization="randn", p_initialization="linspace"):
    """Deterministic parameter init mirroring GAL.__init__ shapes."""
    n = borders
    kp, kk, kb = jax.random.split(key, 3)

    if p_initialization == "linspace":
        p_r = jnp.linspace(1.0 / n, float(n), n)
        p_l = -p_r
    elif p_initialization == "logspace":
        p_r = 2.0 ** jnp.linspace(-1.0, 6.0, n)
        p_l = -p_r
    else:  # cumulative_uniform
        u = jnp.clip(jax.random.uniform(kp, (n,)), 0.1, None)
        p_r = jnp.cumsum(u)
        p_l = -p_r
    p = jnp.concatenate([jnp.flip(p_l), jnp.zeros(1), p_r])  # (2n+1,)

    m = n + 1
    if k_initialization == "ones":
        k_l = jnp.ones(m)
        k_r = jnp.ones(m)
    elif k_initialization == "randn":
        k_l = jax.random.normal(kk, (m,))
        k_r = jax.random.normal(jax.random.fold_in(kk, 1), (m,))
    else:  # leaky_relu
        k_l = jnp.ones(m) * 0.01
        k_r = jnp.ones(m)
    k = jnp.concatenate([jnp.flip(k_l), k_r])  # (2n+2,)

    b_g = jax.random.normal(kb, (1,))
    return p.astype(jnp.float32), k.astype(jnp.float32), b_g.astype(jnp.float32)


def gal_reference(x, p, k, b_g):
    a = (k[0] + k[-1]) / 2.0
    c = (k[1:] - k[:-1]) / 2.0
    out = jnp.sum(jnp.abs(x[..., None].astype(jnp.float32) - p) * c, axis=-1)
    return (a * x.astype(jnp.float32) + out + b_g[0]).astype(x.dtype)


if __name__ == "__main__":
    key = jax.random.PRNGKey(0)
    kx, kparam = jax.random.split(key)

    # Small NCHW input, like the PyTorch module would see.
    x = jax.random.normal(kx, (2, 4, 16, 16), dtype=jnp.float32)

    p, k, b_g = init_gal_params(kparam, borders=1,
                                k_initialization="randn",
                                p_initialization="linspace")

    out = gal_forward(x, p, k, b_g)
    out = jax.block_until_ready(out)

    ref = gal_reference(x, p, k, b_g)
    assert out.shape == x.shape and out.dtype == x.dtype
    assert jnp.allclose(out, ref, atol=1e-5, rtol=1e-5), "mismatch vs reference"

    print("KERNEL_OK")
</pallas_src>

<mosaic_0001>
module attributes {stable_mosaic.version = 11 : i64} {
  func.func @_gal_kernel(%arg0: i32, %arg1: memref<3xf32, #tpu.memory_space<smem>>, %arg2: memref<3xf32, #tpu.memory_space<smem>>, %arg3: memref<1xf32, #tpu.memory_space<smem>>, %arg4: memref<1xf32, #tpu.memory_space<smem>>, %arg5: memref<8x128xf32, #tpu.memory_space<vmem>>, %arg6: memref<8x128xf32, #tpu.memory_space<vmem>>) attributes {dimension_semantics = [#tpu.dimension_semantics<parallel>], iteration_bounds = array<i64: 2>, scalar_prefetch = 0 : i64, scratch_operands = 0 : i64, tpu.core_type = #tpu.core_type<tc>, window_params = [{transform_indices = @transform_0, window_bounds = array<i64: 3>}, {transform_indices = @transform_1, window_bounds = array<i64: 3>}, {transform_indices = @transform_2, window_bounds = array<i64: 1>}, {transform_indices = @transform_3, window_bounds = array<i64: 1>}, {transform_indices = @transform_4, window_bounds = array<i64: 8, 128>}, {transform_indices = @transform_5, window_bounds = array<i64: 8, 128>}]} {
    %c0 = arith.constant 0 : index
    %0 = memref.load %arg3[%c0] : memref<1xf32, #tpu.memory_space<smem>>
    %c0_0 = arith.constant 0 : index
    %1 = memref.load %arg4[%c0_0] : memref<1xf32, #tpu.memory_space<smem>>
    %c0_1 = arith.constant 0 : index
    %c0_2 = arith.constant 0 : index
    %2 = vector.load %arg5[%c0_1, %c0_2] : memref<8x128xf32, #tpu.memory_space<vmem>>, vector<8x128xf32>
    %3 = vector.broadcast %0 : f32 to vector<8x128xf32>
    %4 = arith.mulf %3, %2 : vector<8x128xf32>
    %5 = vector.broadcast %1 : f32 to vector<8x128xf32>
    %6 = arith.addf %4, %5 : vector<8x128xf32>
    %c0_3 = arith.constant 0 : index
    %7 = memref.load %arg1[%c0_3] : memref<3xf32, #tpu.memory_space<smem>>
    %8 = vector.broadcast %7 : f32 to vector<8x128xf32>
    %9 = arith.subf %2, %8 : vector<8x128xf32>
    %10 = math.absf %9 : vector<8x128xf32>
    %c0_4 = arith.constant 0 : index
    %11 = memref.load %arg2[%c0_4] : memref<3xf32, #tpu.memory_space<smem>>
    %12 = vector.broadcast %11 : f32 to vector<8x128xf32>
    %13 = arith.mulf %10, %12 : vector<8x128xf32>
    %14 = arith.addf %6, %13 : vector<8x128xf32>
    %c1 = arith.constant 1 : index
    %15 = memref.load %arg1[%c1] : memref<3xf32, #tpu.memory_space<smem>>
    %16 = vector.broadcast %15 : f32 to vector<8x128xf32>
    %17 = arith.subf %2, %16 : vector<8x128xf32>
    %18 = math.absf %17 : vector<8x128xf32>
    %c1_5 = arith.constant 1 : index
    %19 = memref.load %arg2[%c1_5] : memref<3xf32, #tpu.memory_space<smem>>
    %20 = vector.broadcast %19 : f32 to vector<8x128xf32>
    %21 = arith.mulf %18, %20 : vector<8x128xf32>
    %22 = arith.addf %14, %21 : vector<8x128xf32>
    %c2 = arith.constant 2 : index
    %23 = memref.load %arg1[%c2] : memref<3xf32, #tpu.memory_space<smem>>
    %24 = vector.broadcast %23 : f32 to vector<8x128xf32>
    %25 = arith.subf %2, %24 : vector<8x128xf32>
    %26 = math.absf %25 : vector<8x128xf32>
    %c2_6 = arith.constant 2 : index
    %27 = memref.load %arg2[%c2_6] : memref<3xf32, #tpu.memory_space<smem>>
    %28 = vector.broadcast %27 : f32 to vector<8x128xf32>
    %29 = arith.mulf %26, %28 : vector<8x128xf32>
    %30 = arith.addf %22, %29 : vector<8x128xf32>
    %c0_7 = arith.constant 0 : index
    %c0_8 = arith.constant 0 : index
    %31 = vector.load %arg6[%c0_7, %c0_8] : memref<8x128xf32, #tpu.memory_space<vmem>>, vector<8x128xf32>
    tpu.vector_store %arg6[%c0_7, %c0_8], %30 {strides = array<i32>} : memref<8x128xf32, #tpu.memory_space<vmem>>, vector<8x128xf32>,
    return
  }
  func.func @transform_0(%arg0: i32) -> i32 {
    %c0_i32 = arith.constant 0 : i32
    %c0_i32_0 = arith.constant 0 : i32
    return %c0_i32 : i32
  }
  func.func @transform_1(%arg0: i32) -> i32 {
    %c0_i32 = arith.constant 0 : i32
    %c0_i32_0 = arith.constant 0 : i32
    return %c0_i32 : i32
  }
  func.func @transform_2(%arg0: i32) -> i32 {
    %c0_i32 = arith.constant 0 : i32
    %c0_i32_0 = arith.constant 0 : i32
    return %c0_i32 : i32
  }
  func.func @transform_3(%arg0: i32) -> i32 {
    %c0_i32 = arith.constant 0 : i32
    %c0_i32_0 = arith.constant 0 : i32
    return %c0_i32 : i32
  }
  func.func @transform_4(%arg0: i32) -> (i32, i32) {
    %c0_i32 = arith.constant 0 : i32
    %c0_i32_0 = arith.constant 0 : i32
    return %arg0, %c0_i32 : i32, i32
  }
  func.func @transform_5(%arg0: i32) -> (i32, i32) {
    %c0_i32 = arith.constant 0 : i32
    %c0_i32_0 = arith.constant 0 : i32
    return %arg0, %c0_i32 : i32, i32
  }
}

</mosaic_0001>

<bundles_post_ra>
// kernel: tpu_custom_call.1
= control target key start
LH: loop header
LB: loop body
LE: loop exit
PB: predicated region body
PF: predicated region fallthrough
CT: control target
= control target key end

     0   :  { %s821_s0 = inlined_call_operand.vmem [shape: f32[3], index: 0, kind: input, shape index: {}]   ;;  %s822_s1 = inlined_call_operand.vmem [shape: f32[3], index: 1, kind: input, shape index: {}]   ;;  %s823_s2 = inlined_call_operand.<no memory space> [shape: f32[1], index: 2, kind: input, shape index: {}]   ;;  %s824_s3 = inlined_call_operand.<no memory space> [shape: f32[1], index: 3, kind: input, shape index: {}]   ;;  %s825_s4 = inlined_call_operand.hbm [shape: f32[16,128], index: 4, kind: input, shape index: {}]   ;;  %s826_s5 = inlined_call_operand.hbm [shape: f32[16,128], index: 5, kind: output, shape index: {}]  }
   0x1   :  { %10 = sst [smem:[#allocation2]] %s823_s2 }
   0x2   :  { %11 = sst [smem:[#allocation3]] %s824_s3 }
   0x3   :  { %12 = vsyncpa [#allocation7], 0 }
   0x4   :  { %13 = vsyncpa [#allocation9], 0 }
   0x5   :  { %14 = vsyncpa [#allocation5], 0 }
   0x6   :  { %16 = vsyncpa [#allocation5 + $0x1], 0 }
   0x7   :  { %17 = vsyncpa [#allocation6], 0 }
   0x8   :  { %19 = vsyncpa [#allocation6 + $0x1], 0  ;;  %s672_s22 = smov 0   ;;  %s674_s23 = smov 0  }
   0x9   :  { %s676_s24 = smov 0   ;;  %s678_s25 = smov 0  }
   0xa LB: > { %s693_s2 = sadd.s32 4294967295, %s632_s25   ;;  %s411_s3 = sadd.s32 4294967294, %s632_s25   ;;  %s632_s25 = sphi %s678_s25, %s836_s25   ;;  %s628_s24 = sphi %s676_s24, %s835_s24   ;;  %s624_s23 = sphi %s674_s23, %s834_s23   ;;  %s620_s22 = sphi %s672_s22, %s833_s22  }
   0xb   : > { %p129_p0 = scmp.ne.s32.totalorder %s624_s23, %s620_s22  ;;  %p130_p1 = scmp.eq.s32.totalorder %s693_s2, 0 }
   0xc   : > { %p153_p2 = scmp.eq.s32.totalorder %s693_s2, 1  ;;  %p159_p3 = scmp.eq.s32.totalorder %s411_s3, 1 }
   0xd   : > { %p702_p4 = por %p130_p1, %p129_p0  ;;  %p412_p5 = scmp.ge.s32.totalorder %s632_s25, 1 }
   0xe   : > { %p707_p6 = por %p159_p3, %p129_p0  ;;  %p166_p7 = scmp.lt.s32.totalorder %s632_s25, 3 }
   0xf   : > { %s178_s30 = sshll.u32 %s821_s0, 4  ;;  %s188_s9 = sshll.u32 %s822_s1, 4  ;;  %s179_s30 = int_to_ptr.vmem [resolvable:$true] %s178_s30  ;;  %s189_s9 = int_to_ptr.vmem [resolvable:$true] %s188_s9 }
  0x10   : > { %p715_p8 = pnand %p412_p5, %p166_p7  ;;  %s728_s10 = sadd.s32 1, %s632_s25  }
  0x11   : > { %s113_s11 = ssub.s32 %s632_s25, %s728_s10  ;;  %s634_s12 = smov [#allocation4]  }
  0x12   : > { %p443_p10 = pneg %p715_p8  ;;  %s635_s13 = smov [#allocation8]  }
  0x13   : > { %p114_p12 = scmp.eq.s32.totalorder %s113_s11, 0  ;;  %s116_s14 = sadd.s32 1, %s628_s24 }
  0x14   : > { %p444_p11 = pnand %p443_p10, %p130_p1  ;;  %p123_p13 = scmp.ne.s32.totalorder %s628_s24, %s624_s23 }
  0x15   : > { %p124_p0 = scmp.eq.s32.totalorder %s632_s25, 0  ;;  %p460_p7 = scmp.lt.s32.totalorder %s632_s25, 2 }
  0x16   : > { %446 = dma.vmem_to_smem (!%p444_p11), %s179_s30, 16, %s634_s12, [#allocation7]  }
  0x17   : > { %449 = dma.vmem_to_smem (!%p444_p11), %s189_s9, 16, %s635_s13, [#allocation9]  }
  0x18   : > { %s737_s15 = scalar_select %p114_p12, %s628_s24, %s116_s14  }
  0x19   : > { %p125_p3 = por %p124_p0, %p123_p13  ;;  %p741_p5 = por %p153_p2, %p123_p13 }
  0x1a   : > { %s205_s17 = sand.u32 1, %s628_s24   ;;  %s417_s19 = sshll.u32 %s632_s25, 3 }
  0x1b   : > { %s416_s18 = sshll.u32 %s205_s17, 3  ;;  %s213_s3 = scalar_lea.hbm %s825_s4, %s417_s19 }
  0x1c   : > { %s209_s28 = scalar_lea.vmem [#allocation10], %s416_s18  ;;  %s215_s30 = sshll.u32 %s213_s3, 4  ;;  %s216_s30 = int_to_ptr.hbm [resolvable:$true] %s215_s30 }
  0x1d   : > { %s217_s29 = sshll.u32 %s209_s28, 4  ;;  %p751_p10 = pnand %p460_p7, %p125_p3  ;;  %s218_s29 = int_to_ptr.vmem [resolvable:$true] %s217_s29 }
  0x1e   : > { %s206_s8 = scalar_lea.sflag [#allocation5], %s205_s17  ;;  %s528_s9 = sshra.s32 %s216_s30, 4  ;;  %s529_s9 = int_to_ptr.hbm [resolvable:$true] %s528_s9 }
  0x1f   : > { %s530_s11 = scalar_lea.hbm %s529_s9, 8  ;;  %p532_p11 = pneg %p751_p10 }
  0x20   : > { %p531_p2 = scmp.ne.s32.totalorder %s529_s9, %s530_s11  ;;  %s535_s14 = scalar_lea.hbm %s825_s4, 16 }
  0x21   : > { %p536_p0 = scmp.lt.s32.totalorder %s529_s9, %s825_s4  ;;  %p537_p3 = scmp.lt.s32.totalorder %s535_s14, %s530_s11 }
  0x22   : > { %p533_p12 = pnand %p532_p11, %p531_p2 }
  0x23   : > { %p538_p7 = por %p537_p3, %p536_p0 }
  0x24   : > { %p534_p13 = pneg %p533_p12 }
  0x26   : > { %p539_p9 = pnand %p538_p7, %p534_p13 }
  0x28   : > { %542 = shalt.err (!%p539_p9)
}
  0x29   : > { %453 = dma.hbm_to_vmem [thread:$0]  (!%p751_p10), %s216_s30, 128, %s218_s29, %s206_s8  }
  0x2a   : > { %226 = sbr.rel (%p715_p8) target bundleno = 80 (0x50), region = 40 }
  0x2f   : > { %603 = dma.done.wait (%p130_p1), [#allocation7], 16  }
  0x30   : > { %605 = vsyncadd (%p130_p1), [#allocation7], 4294967280 }
  0x31   : > { %607 = dma.done.wait (%p130_p1), [#allocation9], 16  }
  0x32   : > { %609 = vsyncadd (%p130_p1), [#allocation9], 4294967280  ;;  %s776_s17 = sand.u32 1, %s624_s23  }
  0x33   : > { %s421_s6 = sshll.u32 %s776_s17, 3  ;;  %s239_s20 = scalar_lea.sflag [#allocation5], %s776_s17 }
  0x34   : > { %s242_s21 = scalar_lea.vmem [#allocation10], %s421_s6 }
  0x35   : > { %611 = dma.done.wait (%p702_p4), %s239_s20, 128  }
  0x36   : > { %613 = vsyncadd (%p702_p4), %s239_s20, 4294967168 }
  0x37   : > { %248 = sfence }
  0x38   : > { %s271_s3 = sld [smem:[#allocation2]]  ;;  %v273_v0 = vld [vmem:[%s242_s21] sm:$0xff]  ;;  %s428_s26 = sshll.u32 %s693_s2, 3 }
  0x39   : > { %s272_s28 = sld [smem:[#allocation3]]  ;;  %s314_s14 = scalar_lea.hbm %s826_s5, %s428_s26 }
  0x3a   : > { %s278_s29 = sld [smem:[#allocation4]]  ;;  %s270_s2 = scalar_lea.vmem [#allocation11], %s421_s6 }
  0x3b   : > { %s282_s30 = sld [smem:[#allocation8]]  ;;  %s316_s18 = sshll.u32 %s270_s2, 4  ;;  %s317_s18 = int_to_ptr.vmem [resolvable:$true] %s316_s18 }
  0x3c   : > { %s423_s7 = sld [smem:[#allocation4 + $0x1]]  ;;  %s318_s19 = sshll.u32 %s314_s14, 4  ;;  %s319_s19 = int_to_ptr.hbm [resolvable:$true] %s318_s19 }
  0x3d   : > { %s424_s8 = sld [smem:[#allocation8 + $0x1]]  ;;  %s304_s20 = scalar_lea.sflag [#allocation6], %s776_s17 }
  0x3e   : > { %v274_v1 = vstv %s271_s3  ;;  %s425_s9 = sld [smem:[#allocation4 + $0x2]]  ;;  %s572_s21 = sshra.s32 %s319_s19, 4  ;;  %s573_s21 = int_to_ptr.hbm [resolvable:$true] %s572_s21 }
  0x3f   : > { %v275_v2 = vmul.f32 %v274_v1, %v273_v0  ;;  %s426_s11 = sld [smem:[#allocation8 + $0x2]]  ;;  %v276_v3 = vstv %s272_s28  ;;  %s574_s3 = scalar_lea.hbm %s573_s21, 8 }
  0x40   : > { %v279_v4 = vstv %s278_s29  ;;  %p575_p1 = scmp.ne.s32.totalorder %s573_s21, %s574_s3  ;;  %s578_s6 = scalar_lea.hbm %s826_s5, 16 }
  0x41   : > { %v280_v5 = vsub.f32 %v273_v0, %v279_v4  ;;  %v283_v6 = vstv %s282_s30  ;;  %v277_v8 = vadd.f32 %v276_v3, %v275_v2  ;;  %p579_p9 = scmp.lt.s32.totalorder %s573_s21, %s826_s5  ;;  %p580_p10 = scmp.lt.s32.totalorder %s578_s6, %s574_s3 }
  0x42   : > { %v287_v7 = vstv %s423_s7  ;;  %p576_p4 = pnand %p575_p1, %p741_p5 }
  0x43   : > { %v281_v9 = vand.u32 2147483647, %v280_v5  ;;  %v288_v10 = vsub.f32 %v273_v0, %v287_v7  ;;  %v291_v11 = vstv %s424_s8  ;;  %p581_p2 = por %p580_p10, %p579_p9 }
  0x44   : > { %v295_v12 = vstv %s425_s9  ;;  %p577_p8 = pneg %p576_p4 }
  0x45   : > { %v284_v13 = vmul.f32 %v283_v6, %v281_v9  ;;  %v289_v14 = vand.u32 2147483647, %v288_v10  ;;  %v296_v15 = vsub.f32 %v273_v0, %v295_v12  ;;  %v299_v16 = vstv %s426_s11 }
  0x46   : > { %p582_p11 = pnand %p581_p2, %p577_p8 }
  0x47   : > { %v285_v17 = vadd.f32 %v284_v13, %v277_v8  ;;  %v292_v18 = vmul.f32 %v291_v11, %v289_v14  ;;  %v297_v19 = vand.u32 2147483647, %v296_v15 }
  0x49   : > { %v293_v20 = vadd.f32 %v292_v18, %v285_v17  ;;  %v300_v21 = vmul.f32 %v299_v16, %v297_v19 }
  0x4b   : > { %v301_v22 = vadd.f32 %v300_v21, %v293_v20 }
  0x4d   : > { %302 = vst [vmem:[%s270_s2] sm:$0xff] %v301_v22 }
  0x4e   : > { %585 = shalt.err (!%p582_p11)
}
  0x4f   : > { %441 = dma.vmem_to_hbm [thread:$0]  (%p741_p5), %s317_s18, 128, %s319_s19, %s304_s20  }
  0x50 PF: > { %s330_s17 = sand.u32 1, %s620_s22   ;;  %p832_p12 = scmp.ge.s32.totalorder %s632_s25, 2 }
  0x51   : > { %s331_s8 = scalar_lea.sflag [#allocation6], %s330_s17 }
  0x52   : > { %p455_p13 = pnand %p832_p12, %p707_p6 }
  0x54   : > { %p456_p0 = pneg %p455_p13 }
  0x56   : > { %615 = dma.done.wait (%p456_p0), %s331_s8, 128  }
  0x57   : > { %617 = vsyncadd (%p456_p0), %s331_s8, 4294967168  ;;  %p22_p3 = scmp.ge.s32.totalorder %s728_s10, 4   ;;  %s833_s22 = smov %s624_s23 }
  0x58   : > { %s834_s23 = smov %s628_s24  ;;  %s835_s24 = smov %s737_s15 }
  0x59   : > { %s836_s25 = smov %s728_s10  ;;  %24 = sbr.rel (!%p22_p3) target bundleno = 10 (0xa), region = 94 }
  0x5e   :  { %337 = vsyncpa [#allocation5], 1 }
  0x5f   :  { %339 = vsyncpa [#allocation5 + $0x1], 1 }
  0x60   :  { %340 = vsyncpa [#allocation6], 1 }
  0x61   :  { %342 = vsyncpa [#allocation6 + $0x1], 1 }
  0x62   :  { %343 = vsyncpa [#allocation7], 1 }
  0x63   :  { %345 = vsyncpa [#allocation7 + $0x1], 1 }
  0x64   :  { %346 = vsyncpa [#allocation9], 1 }

</bundles_post_ra>
